<compile_context>
chip_gen: v5e
topology: v5e:2x2
jax: 0.10.0
libtpu: 0.0.40
codegen_flags: <defaults>
</compile_context>

<pallas_src>
import functools
import math

import jax
import jax.numpy as jnp
from jax import lax
from jax.experimental import pallas as pl
from jax.experimental.pallas import tpu as pltpu


def _nce_kernel(k_ref, q_ref, o_ref, kscale_ref, m_ref, l_ref, diag_ref, *,
                inv_temperature, pad_cols, normalized):
    i = pl.program_id(0)
    j = pl.program_id(1)
    nj = pl.num_programs(1)
    tm = k_ref.shape[0]
    tn = q_ref.shape[0]

    # ---- once per row tile: pre-scale k by 1/T and reset running state -----
    @pl.when(j == 0)
    def _():
        kscale_ref[...] = (k_ref[...] * inv_temperature).astype(kscale_ref.dtype)
        l_ref[...] = jnp.zeros_like(l_ref)
        diag_ref[...] = jnp.zeros_like(diag_ref)
        if not normalized:
            m_ref[...] = jnp.full_like(m_ref, -jnp.inf)

    # ---- [TM, TN] logits tile on the MXU (contract last dims, no transpose) -
    logits = lax.dot_general(
        kscale_ref[...], q_ref[...],
        dimension_numbers=(((1,), (1,)), ((), ())),
        preferred_element_type=jnp.float32)                       # [TM, TN] f32

    # ---- diagonal logits (the CE targets), only from overlapping tile(s) ----
    row_lo = i * tm
    col_lo = j * tn

    @pl.when(jnp.logical_and(col_lo < row_lo + tm, row_lo < col_lo + tn))
    def _():
        rows = row_lo + lax.broadcasted_iota(jnp.int32, (tm, tn), 0)
        cols = col_lo + lax.broadcasted_iota(jnp.int32, (tm, tn), 1)
        diag_ref[...] += jnp.sum(jnp.where(rows == cols, logits, 0.0),
                                 axis=-1, keepdims=True)

    # ---- online (streaming) logsumexp over the column tiles ----------------
    if normalized:
        # L2-normalized embeddings: logits <= 1/T statically, so no online max.
        l_ref[...] += jnp.sum(jnp.exp(logits - inv_temperature),
                              axis=-1, keepdims=True)
    else:
        m_prev = m_ref[...]
        m_new = jnp.maximum(m_prev, jnp.max(logits, axis=-1, keepdims=True))
        p_sum = jnp.sum(jnp.exp(logits - m_new), axis=-1, keepdims=True)
        l_ref[...] = jnp.exp(m_prev - m_new) * l_ref[...] + p_sum
        m_ref[...] = m_new

    # ---- finalize this row tile --------------------------------------------
    @pl.when(j == nj - 1)
    def _():
        l = l_ref[...]
        if pad_cols:
            # Zero-padded q rows produce logits == 0 exactly; remove their
            # exp(0 - m) contribution instead of masking every step.
            if normalized:
                l = l - pad_cols * math.exp(-inv_temperature)
            else:
                l = l - pad_cols * jnp.exp(-m_ref[...])
        m = inv_temperature if normalized else m_ref[...]
        # TODO(synk): output stays [TM, 1] (masked vst); a lane-dense [1, TM]
        # write needs a (TM,1)->(1,TM) relayout and this store only runs once
        # per row tile, so the win is negligible.
        o_ref[...] = (m + jnp.log(l)) - diag_ref[...]


def _round_up(x, m):
    return ((x + m - 1) // m) * m


def _vmem_budget_and_limit():
    """Per-generation VMEM budget (v7x has 64 MiB/TC, v5e/v6e have 128 MiB)."""
    cap = 64 * 1024 * 1024
    try:
        cap = int(getattr(pltpu.get_tpu_info(), "vmem_capacity_bytes", cap))
    except Exception:
        pass
    budget = min(int(cap * 0.65), 96 * 1024 * 1024)
    limit = max(min(budget + 16 * 1024 * 1024, cap - 8 * 1024 * 1024),
                32 * 1024 * 1024)
    return budget, limit


def _select_tiles(n, d, itemsize, block_m, block_n, vmem_budget):
    # Roofline-driven defaults: TM large enough to be compute-bound
    # (~2*TM/itemsize flops per byte of streamed q), TN large enough that
    # per-step fixed overhead (~0.35 us) is amortized.
    if block_m is None:
        block_m = 1024 if itemsize <= 2 else 512
    if block_n is None:
        block_n = 1024
    tm = _round_up(min(block_m, _round_up(n, 8)), 8)
    tn = _round_up(min(block_n, _round_up(n, 8)), 8)

    def est(tm_, tn_):
        return (2 * (tm_ + tn_) * d * itemsize   # double-buffered k/q input tiles
                + tm_ * d * itemsize             # pre-scaled k scratch
                + 5 * tm_ * tn_ * 4              # f32 logits/exp/mask temporaries
                + 8 * tm_ * 4)                   # [TM,1] state + output

    while est(tm, tn) > vmem_budget and tn > 256:
        tn = max(256, tn // 2)
    while est(tm, tn) > vmem_budget and tm > 256:
        tm = max(256, tm // 2)
    while est(tm, tn) > vmem_budget and tn > 8:
        tn = max(8, tn // 2)
    while est(tm, tn) > vmem_budget and tm > 8:
        tm = max(8, tm // 2)
    return tm, tn


def nce_loss(k, q, temperature, *, normalized=False, block_m=None, block_n=None):
    """Pallas-backed PointInfoNCE loss. k, q: [N, D] (same float dtype).

    normalized=True enables the static-max fast path; only valid if k and q
    rows are L2-normalized (|logits| <= 1/temperature).
    """
    n, d = k.shape
    assert q.shape == (n, d), "k and q must both be [N, D]"

    itemsize = k.dtype.itemsize
    vmem_budget, vmem_limit = _vmem_budget_and_limit()
    tm, tn = _select_tiles(n, d, itemsize, block_m, block_n, vmem_budget)

    rows_pad = _round_up(n, tm)
    cols_pad = _round_up(n, tn)
    k_p = jnp.pad(k, ((0, rows_pad - n), (0, 0))) if rows_pad != n else k
    q_p = jnp.pad(q, ((0, cols_pad - n), (0, 0))) if cols_pad != n else q

    kernel = functools.partial(
        _nce_kernel,
        inv_temperature=float(1.0 / temperature),
        pad_cols=int(cols_pad - n),
        normalized=bool(normalized))

    per_row = pl.pallas_call(
        kernel,
        grid=(rows_pad // tm, cols_pad // tn),
        in_specs=[
            pl.BlockSpec((tm, d), lambda i, j: (i, 0)),   # k row tile
            pl.BlockSpec((tn, d), lambda i, j: (j, 0)),   # q column tile (streamed)
        ],
        out_specs=pl.BlockSpec((tm, 1), lambda i, j: (i, 0)),
        out_shape=jax.ShapeDtypeStruct((rows_pad, 1), jnp.float32),
        scratch_shapes=[
            pltpu.VMEM((tm, d), k_p.dtype),     # k row tile pre-scaled by 1/T
            pltpu.VMEM((tm, 1), jnp.float32),   # running row max
            pltpu.VMEM((tm, 1), jnp.float32),   # running row sum(exp)
            pltpu.VMEM((tm, 1), jnp.float32),   # diagonal logits
        ],
        compiler_params=pltpu.CompilerParams(
            dimension_semantics=("parallel", "arbitrary"),
            vmem_limit_bytes=int(vmem_limit)),
    )(k_p, q_p)

    # Mean over the true batch size N (padded rows excluded); cheap XLA-side.
    return jnp.mean(per_row[:n, 0])


def nce_loss_ref(k, q, temperature):
    """Plain-JAX reference (torch CrossEntropyLoss with arange targets)."""
    logits = jnp.dot(k.astype(jnp.float32), q.astype(jnp.float32).T,
                     precision=lax.Precision.HIGHEST) / temperature
    lse = jax.nn.logsumexp(logits, axis=-1)
    return jnp.mean(lse - jnp.diagonal(logits))


if __name__ == "__main__":
    key = jax.random.PRNGKey(0)
    k1, k2, k3, k4 = jax.random.split(key, 4)
    temperature = 0.07
    rtol = atol = 5e-3  # MXU default matmul precision vs f32-exact reference

    # 1) tiny single-tile case
    n, d = 8, 32
    ka = jax.random.normal(k1, (n, d), jnp.float32)
    qa = jax.random.normal(k2, (n, d), jnp.float32)
    out = jax.block_until_ready(nce_loss(ka, qa, temperature))
    ref = jax.block_until_ready(nce_loss_ref(ka, qa, temperature))
    assert jnp.allclose(out, ref, rtol=rtol, atol=atol), (out, ref)

    # 2) multi-tile streaming logsumexp + row/column padding (N % tile != 0)
    n, d = 200, 64
    kb = jax.random.normal(k3, (n, d), jnp.float32)
    qb = jax.random.normal(k4, (n, d), jnp.float32)
    out = jax.block_until_ready(
        nce_loss(kb, qb, temperature, block_m=64, block_n=64))
    ref = jax.block_until_ready(nce_loss_ref(kb, qb, temperature))
    assert jnp.allclose(out, ref, rtol=rtol, atol=atol), (out, ref)

    # 3) L2-normalized fast path (static logit bound, no online max)
    kn = kb[:128] / jnp.linalg.norm(kb[:128], axis=-1, keepdims=True)
    qn = qb[:128] / jnp.linalg.norm(qb[:128], axis=-1, keepdims=True)
    out = jax.block_until_ready(
        nce_loss(kn, qn, temperature, normalized=True, block_m=32, block_n=64))
    ref = jax.block_until_ready(nce_loss_ref(kn, qn, temperature))
    assert jnp.allclose(out, ref, rtol=rtol, atol=atol), (out, ref)

    print("KERNEL_OK")
</pallas_src>

<mosaic_0001>
module attributes {stable_mosaic.version = 11 : i64} {
  func.func @_nce_kernel(%arg0: i32, %arg1: i32, %arg2: memref<8x32xf32, #tpu.memory_space<vmem>>, %arg3: memref<8x32xf32, #tpu.memory_space<vmem>>, %arg4: memref<8x1xf32, #tpu.memory_space<vmem>>, %arg5: memref<8x32xf32, #tpu.memory_space<vmem>>, %arg6: memref<8x1xf32, #tpu.memory_space<vmem>>, %arg7: memref<8x1xf32, #tpu.memory_space<vmem>>, %arg8: memref<8x1xf32, #tpu.memory_space<vmem>>) attributes {dimension_semantics = [#tpu.dimension_semantics<parallel>, #tpu.dimension_semantics<arbitrary>], iteration_bounds = array<i64: 1, 1>, scalar_prefetch = 0 : i64, scratch_operands = 4 : i64, tpu.core_type = #tpu.core_type<tc>, window_params = [{transform_indices = @transform_0, window_bounds = array<i64: 8, 32>}, {transform_indices = @transform_1, window_bounds = array<i64: 8, 32>}, {transform_indices = @transform_2, window_bounds = array<i64: 8, 1>}]} {
    %c0_i32 = arith.constant 0 : i32
    %0 = arith.cmpi eq, %arg1, %c0_i32 : i32
    %1 = arith.extui %0 : i1 to i32
    %c0_i32_0 = arith.constant 0 : i32
    %2 = arith.cmpi ne, %1, %c0_i32_0 : i32
    scf.if %2 {
      %c0_20 = arith.constant 0 : index
      %c0_21 = arith.constant 0 : index
      %34 = vector.load %arg2[%c0_20, %c0_21] : memref<8x32xf32, #tpu.memory_space<vmem>>, vector<8x32xf32>
      %cst_22 = arith.constant 14.2857141 : f32
      %35 = vector.broadcast %cst_22 : f32 to vector<8x32xf32>
      %36 = arith.mulf %34, %35 : vector<8x32xf32>
      %c0_23 = arith.constant 0 : index
      %c0_24 = arith.constant 0 : index
      %37 = vector.load %arg5[%c0_23, %c0_24] : memref<8x32xf32, #tpu.memory_space<vmem>>, vector<8x32xf32>
      tpu.vector_store %arg5[%c0_23, %c0_24], %36 {strides = array<i32>} : memref<8x32xf32, #tpu.memory_space<vmem>>, vector<8x32xf32>,
      %cst_25 = arith.constant 0.000000e+00 : f32
      %38 = vector.broadcast %cst_25 : f32 to vector<8x1xf32>
      %c0_26 = arith.constant 0 : index
      %c0_27 = arith.constant 0 : index
      %39 = vector.load %arg7[%c0_26, %c0_27] : memref<8x1xf32, #tpu.memory_space<vmem>>, vector<8x1xf32>
      tpu.vector_store %arg7[%c0_26, %c0_27], %38 {strides = array<i32>} : memref<8x1xf32, #tpu.memory_space<vmem>>, vector<8x1xf32>,
      %cst_28 = arith.constant 0.000000e+00 : f32
      %40 = vector.broadcast %cst_28 : f32 to vector<8x1xf32>
      %c0_29 = arith.constant 0 : index
      %c0_30 = arith.constant 0 : index
      %41 = vector.load %arg8[%c0_29, %c0_30] : memref<8x1xf32, #tpu.memory_space<vmem>>, vector<8x1xf32>
      tpu.vector_store %arg8[%c0_29, %c0_30], %40 {strides = array<i32>} : memref<8x1xf32, #tpu.memory_space<vmem>>, vector<8x1xf32>,
      %cst_31 = arith.constant 0xFF800000 : f32
      %42 = vector.broadcast %cst_31 : f32 to vector<8x1xf32>
      %c0_32 = arith.constant 0 : index
      %c0_33 = arith.constant 0 : index
      %43 = vector.load %arg6[%c0_32, %c0_33] : memref<8x1xf32, #tpu.memory_space<vmem>>, vector<8x1xf32>
      tpu.vector_store %arg6[%c0_32, %c0_33], %42 {strides = array<i32>} : memref<8x1xf32, #tpu.memory_space<vmem>>, vector<8x1xf32>,
    } else {
    }
    %c0 = arith.constant 0 : index
    %c0_1 = arith.constant 0 : index
    %3 = vector.load %arg5[%c0, %c0_1] : memref<8x32xf32, #tpu.memory_space<vmem>>, vector<8x32xf32>
    %c0_2 = arith.constant 0 : index
    %c0_3 = arith.constant 0 : index
    %4 = vector.load %arg3[%c0_2, %c0_3] : memref<8x32xf32, #tpu.memory_space<vmem>>, vector<8x32xf32>
    %cst = arith.constant dense<0.000000e+00> : vector<8x8xf32>
    %5 = tpu.matmul %3, %4, %cst {dimension_numbers = #tpu.dot_dimension_numbers<[1], [1], [0], [0], [0, 0, 1, 0], [], []>} : vector<8x32xf32>, vector<8x32xf32>, vector<8x8xf32> -> vector<8x8xf32>
    %c8_i32 = arith.constant 8 : i32
    %6 = arith.muli %arg0, %c8_i32 : i32
    %c8_i32_4 = arith.constant 8 : i32
    %7 = arith.muli %arg1, %c8_i32_4 : i32
    %c8_i32_5 = arith.constant 8 : i32
    %8 = arith.addi %6, %c8_i32_5 : i32
    %9 = arith.cmpi slt, %7, %8 : i32
    %c8_i32_6 = arith.constant 8 : i32
    %10 = arith.addi %7, %c8_i32_6 : i32
    %11 = arith.cmpi slt, %6, %10 : i32
    %12 = arith.andi %9, %11 : i1
    %13 = arith.extui %12 : i1 to i32
    %c0_i32_7 = arith.constant 0 : i32
    %14 = arith.cmpi ne, %13, %c0_i32_7 : i32
    scf.if %14 {
      %34 = tpu.iota {dimensions = array<i32: 0>} : vector<8x8xi32>
      %35 = vector.broadcast %6 : i32 to vector<8x8xi32>
      %36 = arith.addi %35, %34 : vector<8x8xi32>
      %37 = tpu.iota {dimensions = array<i32: 1>} : vector<8x8xi32>
      %38 = vector.broadcast %7 : i32 to vector<8x8xi32>
      %39 = arith.addi %38, %37 : vector<8x8xi32>
      %c0_20 = arith.constant 0 : index
      %c0_21 = arith.constant 0 : index
      %40 = vector.load %arg8[%c0_20, %c0_21] : memref<8x1xf32, #tpu.memory_space<vmem>>, vector<8x1xf32>
      %41 = arith.cmpi eq, %36, %39 : vector<8x8xi32>
      %cst_22 = arith.constant 0.000000e+00 : f32
      %42 = vector.broadcast %cst_22 : f32 to vector<8x8xf32>
      %43 = arith.select %41, %5, %42 : vector<8x8xi1>, vector<8x8xf32>
      %cst_23 = arith.constant dense<0.000000e+00> : vector<8xf32>
      %44 = vector.multi_reduction <add>, %43, %cst_23 [1] : vector<8x8xf32> to vector<8xf32>
      %45 = vector.shape_cast %44 : vector<8xf32> to vector<8x1xf32>
      %46 = arith.addf %40, %45 : vector<8x1xf32>
      %c0_24 = arith.constant 0 : index
      %c0_25 = arith.constant 0 : index
      %47 = vector.load %arg8[%c0_24, %c0_25] : memref<8x1xf32, #tpu.memory_space<vmem>>, vector<8x1xf32>
      tpu.vector_store %arg8[%c0_24, %c0_25], %46 {strides = array<i32>} : memref<8x1xf32, #tpu.memory_space<vmem>>, vector<8x1xf32>,
    } else {
    }
    %c0_8 = arith.constant 0 : index
    %c0_9 = arith.constant 0 : index
    %15 = vector.load %arg6[%c0_8, %c0_9] : memref<8x1xf32, #tpu.memory_space<vmem>>, vector<8x1xf32>
    %cst_10 = arith.constant dense<0xFF800000> : vector<8xf32>
    %16 = vector.multi_reduction <maximumf>, %5, %cst_10 [1] : vector<8x8xf32> to vector<8xf32>
    %17 = vector.shape_cast %16 : vector<8xf32> to vector<8x1xf32>
    %18 = arith.maximumf %15, %17 : vector<8x1xf32>
    %19 = vector.broadcast %18 : vector<8x1xf32> to vector<8x8xf32>
    %20 = arith.subf %5, %19 : vector<8x8xf32>
    %21 = math.exp %20 : vector<8x8xf32>
    %cst_11 = arith.constant dense<0.000000e+00> : vector<8xf32>
    %22 = vector.multi_reduction <add>, %21, %cst_11 [1] : vector<8x8xf32> to vector<8xf32>
    %23 = vector.shape_cast %22 : vector<8xf32> to vector<8x1xf32>
    %24 = arith.subf %15, %18 : vector<8x1xf32>
    %25 = math.exp %24 : vector<8x1xf32>
    %c0_12 = arith.constant 0 : index
    %c0_13 = arith.constant 0 : index
    %26 = vector.load %arg7[%c0_12, %c0_13] : memref<8x1xf32, #tpu.memory_space<vmem>>, vector<8x1xf32>
    %27 = arith.mulf %25, %26 : vector<8x1xf32>
    %28 = arith.addf %27, %23 : vector<8x1xf32>
    %c0_14 = arith.constant 0 : index
    %c0_15 = arith.constant 0 : index
    %29 = vector.load %arg7[%c0_14, %c0_15] : memref<8x1xf32, #tpu.memory_space<vmem>>, vector<8x1xf32>
    tpu.vector_store %arg7[%c0_14, %c0_15], %28 {strides = array<i32>} : memref<8x1xf32, #tpu.memory_space<vmem>>, vector<8x1xf32>,
    %c0_16 = arith.constant 0 : index
    %c0_17 = arith.constant 0 : index
    %30 = vector.load %arg6[%c0_16, %c0_17] : memref<8x1xf32, #tpu.memory_space<vmem>>, vector<8x1xf32>
    tpu.vector_store %arg6[%c0_16, %c0_17], %18 {strides = array<i32>} : memref<8x1xf32, #tpu.memory_space<vmem>>, vector<8x1xf32>,
    %c0_i32_18 = arith.constant 0 : i32
    %31 = arith.cmpi eq, %arg1, %c0_i32_18 : i32
    %32 = arith.extui %31 : i1 to i32
    %c0_i32_19 = arith.constant 0 : i32
    %33 = arith.cmpi ne, %32, %c0_i32_19 : i32
    scf.if %33 {
      %c0_20 = arith.constant 0 : index
      %c0_21 = arith.constant 0 : index
      %34 = vector.load %arg7[%c0_20, %c0_21] : memref<8x1xf32, #tpu.memory_space<vmem>>, vector<8x1xf32>
      %c0_22 = arith.constant 0 : index
      %c0_23 = arith.constant 0 : index
      %35 = vector.load %arg6[%c0_22, %c0_23] : memref<8x1xf32, #tpu.memory_space<vmem>>, vector<8x1xf32>
      %36 = math.log %34 : vector<8x1xf32>
      %37 = arith.addf %35, %36 : vector<8x1xf32>
      %c0_24 = arith.constant 0 : index
      %c0_25 = arith.constant 0 : index
      %38 = vector.load %arg8[%c0_24, %c0_25] : memref<8x1xf32, #tpu.memory_space<vmem>>, vector<8x1xf32>
      %39 = arith.subf %37, %38 : vector<8x1xf32>
      %c0_26 = arith.constant 0 : index
      %c0_27 = arith.constant 0 : index
      %40 = vector.load %arg4[%c0_26, %c0_27] : memref<8x1xf32, #tpu.memory_space<vmem>>, vector<8x1xf32>
      tpu.vector_store %arg4[%c0_26, %c0_27], %39 {strides = array<i32>} : memref<8x1xf32, #tpu.memory_space<vmem>>, vector<8x1xf32>,
    } else {
    }
    return
  }
  func.func @transform_0(%arg0: i32, %arg1: i32) -> (i32, i32) {
    %c0_i32 = arith.constant 0 : i32
    %c0_i32_0 = arith.constant 0 : i32
    return %arg0, %c0_i32 : i32, i32
  }
  func.func @transform_1(%arg0: i32, %arg1: i32) -> (i32, i32) {
    %c0_i32 = arith.constant 0 : i32
    %c0_i32_0 = arith.constant 0 : i32
    return %arg1, %c0_i32 : i32, i32
  }
  func.func @transform_2(%arg0: i32, %arg1: i32) -> (i32, i32) {
    %c0_i32 = arith.constant 0 : i32
    %c0_i32_0 = arith.constant 0 : i32
    return %arg0, %c0_i32 : i32, i32
  }
}

</mosaic_0001>

<bundles_post_ra>
// kernel: tpu_custom_call.1
= control target key start
LH: loop header
LB: loop body
LE: loop exit
PB: predicated region body
PF: predicated region fallthrough
CT: control target
= control target key end

     0   :  { %7 = vsyncpa [#allocation7], 0  ;;  %s256_s0 = inlined_call_operand.hbm [shape: f32[8,32], index: 0, kind: input, shape index: {}]   ;;  %s257_s1 = inlined_call_operand.hbm [shape: f32[8,32], index: 1, kind: input, shape index: {}]   ;;  %s258_s2 = inlined_call_operand.vmem [shape: f32[8,1], index: 2, kind: output, shape index: {}]  }
   0x1   :  { %s14_s11 = sshll.u32 %s256_s0, 4  ;;  %s15_s11 = int_to_ptr.hbm [resolvable:$true] %s14_s11 }
   0x2   :  { %8 = vsyncpa [#allocation9], 0  ;;  %s217_s12 = smov [#allocation6]   ;;  %s25_s16 = sshll.u32 %s257_s1, 4  ;;  %s26_s16 = int_to_ptr.hbm [resolvable:$true] %s25_s16 }
   0x3   :  { %s16_s13 = sshll.u32 %s217_s12, 4  ;;  %s218_s17 = smov [#allocation8]   ;;  %s17_s13 = int_to_ptr.vmem [resolvable:$true] %s16_s13 }
   0x4   :  { %19 = dma.hbm_to_vmem [thread:$0]  %s15_s11, 128, %s17_s13, [#allocation7]  }
   0x5   :  { %s27_s18 = sshll.u32 %s218_s17, 4  ;;  %s28_s18 = int_to_ptr.vmem [resolvable:$true] %s27_s18 }
   0x6   :  { %30 = dma.hbm_to_vmem [thread:$0]  %s26_s16, 128, %s28_s18, [#allocation9]  }
   0x7   :  { %213 = dma.done.wait [#allocation7], 128  }
   0x8   :  { %214 = vsyncadd [#allocation7], 4294967168 }
   0x9   :  { %215 = dma.done.wait [#allocation9], 128  }
   0xa   :  { %216 = vsyncadd [#allocation9], 4294967168  ;;  %v43_v0 = vld [vmem:[#allocation6] sm:$0xff]  ;;  %vm45_vm0 = vcmask 261120   ;;  %v52_v1 = vld [vmem:[#allocation8] sm:$0xff]  ;;  %vm47_vm1 = vcmask 7168   ;;  %v90_v16 = vlaneseq }
   0xb   :  { %v44_v2 = vmul.f32 14.285714, %v43_v0  ;;  %151 = vmatpush.xpose.msk.msra.mxu0 %vm45_vm0, %v52_v1  ;;  %v219_v4 = vmov -inf   ;;  %vm101_vm2 = vcmask 64512   ;;  %v220_v7 = vmov 0  }
   0xc   :  { %50 = vst.msk [vmem:[#allocation3] sm:$0xff] %vm47_vm1, %v219_v4  ;;  %158 = vset.pattern.permute.xlu0 %v220_v7  ;;  %v221_v8 = vmov 0.0   ;;  %v91_v17 = vshrl.u32 %v90_v16, 7  ;;  %v95_v18 = vand.u32 127, %v90_v16 }
   0xd   :  { %46 = vst.msk [vmem:[#allocation2] sm:$0xff] %vm45_vm0, %v44_v2 }
   0xe   :  { %48 = vst.msk [vmem:[#allocation4] sm:$0xff] %vm47_vm1, %v221_v8  ;;  %vm99_vm3 = vcmp.eq.s32.totalorder %v91_v17, %v95_v18 }
   0xf   :  { %49 = vst.msk [vmem:[#allocation5] sm:$0xff] %vm47_vm1, %v221_v8 }
  0x13   :  { %v108_v9 = vld [vmem:[#allocation3] sm:$0xff] }
  0x14   :  { %v51_v3 = vld [vmem:[#allocation2] sm:$0xff] }
  0x15   :  { %152 = vmatmul.msk.f32.vlgmr.msra.gmra.mxu0 %vm45_vm0, %v51_v3  ;;  %v128_v25 = vld [vmem:[#allocation4] sm:$0xff] }
  0x16   :  { %v98_v29 = vld [vmem:[#allocation5] sm:$0xff] }
  0x92   :  { %v77_v5 = vpop.f32.mrf.mxu0 }
  0x93   :  { %v110_v6 = vsel %vm101_vm2, %v77_v5, -inf  ;;  %v100_v21 = vsel %vm99_vm3, %v77_v5, 0.0 }
  0x94   :  { %111 = vmax.xlane.f32.xlu0 %v110_v6  ;;  %v102_v22 = vsel %vm101_vm2, %v100_v21, 0.0 }
 0x107   :  { %v112_v10 = vpop.xlane.xlu0 %111 }
 0x108   :  { %v113_v11 = vmax.f32 %v108_v9, %v112_v10 }
 0x10a   :  { %v125_v12 = vsub.f32 %v108_v9, %v113_v11  ;;  %133 = vst.msk [vmem:[#allocation3] sm:$0xff] %vm47_vm1, %v113_v11  ;;  %116 = vperm.xlu0 %158, %v113_v11  }
 0x10c   :  { %v126_v23 = vmul.f32 1.442695, %v125_v12 }
 0x111   :  { %v138_v35 = vld [vmem:[#allocation3] sm:$0xff] }
 0x17c   :  { %v117_v13 = vpop.permute.xlu0 %116 }
 0x17d   :  { %v119_v14 = vsub.f32 %v77_v5, %v117_v13 }
 0x17f   :  { %v120_v15 = vmul.f32 1.442695, %v119_v14 }
 0x181   :  { %159 = vpow2.f32 %v120_v15 }
 0x182   :  { %161 = vpow2.f32 %v126_v23 }
 0x187   :  { %v160_v19 = vpop.eup %159 }
 0x188   :  { %v122_v20 = vsel %vm101_vm2, %v160_v19, 0.0  ;;  %v162_v24 = vpop.eup %161 }
 0x189   :  { %123 = vadd.xlane.f32.xlu1 %v122_v20  ;;  %v129_v26 = vmul.f32 %v162_v24, %v128_v25 }
 0x191   :  { %103 = vadd.xlane.f32.xlu1 %v102_v22 }
 0x1fc   :  { %v124_v27 = vpop.xlane.xlu1 %123 }
 0x1fd   :  { %v130_v28 = vadd.f32 %v129_v26, %v124_v27 }
 0x1ff   :  { %132 = vst.msk [vmem:[#allocation4] sm:$0xff] %vm47_vm1, %v130_v28 }
 0x204   :  { %v104_v30 = vpop.xlane.xlu1 %103 }
 0x205   :  { %v105_v31 = vadd.f32 %v104_v30, %v98_v29 }
 0x206   :  { %v137_v32 = vld [vmem:[#allocation4] sm:$0xff] }
 0x207   :  { %163 = vlog2.f32 %v137_v32  ;;  %107 = vst.msk [vmem:[#allocation5] sm:$0xff] %vm47_vm1, %v105_v31 }
 0x20d   :  { %v164_v33 = vpop.eup %163 }
 0x20e   :  { %v140_v34 = vmul.f32 0.6931472, %v164_v33  ;;  %v142_v37 = vld [vmem:[#allocation5] sm:$0xff] }
 0x210   :  { %v141_v36 = vadd.f32 %v140_v34, %v138_v35 }
 0x212   :  { %v143_v38 = vsub.f32 %v141_v36, %v142_v37 }
 0x214   :  { %144 = vst.msk [vmem:[%s258_s2] sm:$0xff] %vm47_vm1, %v143_v38 }
 0x215   :  { %149 = vsyncpa [#allocation7], 1 }
 0x216   :  { %150 = vsyncpa [#allocation9], 1 }

</bundles_post_ra>
